<compile_context>
chip_gen: v7x
topology: tpu7x:2x2x1
jax: 0.10.0
libtpu: 0.0.40
codegen_flags: <defaults>
</compile_context>

<pallas_src>
import functools
import math

import jax
import jax.numpy as jnp
from jax.experimental import pallas as pl
from jax.experimental.pallas import tpu as pltpu

_ROW_QUANTUM = 256  # row-padding quantum: multiple of 16 (bf16 packs 2 rows / sublane)


def _round_up(x, m):
    return ((x + m - 1) // m) * m


def _pick_row_tiling(n, tm_target):
    """Pad N to a small quantum (not to tm) and pick the row tile.

    Keeps grid >= 2 whenever the batch allows so both v7x TensorCores get sharded work
    (v5e/v6e have a single TC and are indifferent).  Returns (n_pad, tm) with tm | n_pad.
    """
    q = _ROW_QUANTUM
    tm = max(q, (tm_target // q) * q)                 # target tile, multiple of q
    tm = min(tm, _round_up(n, q))                     # never exceed the padded batch
    half = max(q, (_round_up(n, 2 * q) // 2 // q) * q)
    tm = min(tm, half)                                # grid >= 2 once n > one quantum
    n_pad = _round_up(n, tm)
    return n_pad, tm


def _prepare_weight(linear_mappings):
    """nn.Linear weight, transposed and zero-padded to a lane-dense (D_enc, 128k) bf16."""
    w = jnp.asarray(linear_mappings, jnp.float32)
    w = w.reshape(-1, w.shape[-1])                    # (M, D_enc)
    m_out, d_enc = w.shape
    m_pad = _round_up(max(m_out, 128), 128)           # lane-dense output width
    wt = jnp.zeros((d_enc, m_pad), jnp.bfloat16)
    wt = wt.at[:, :m_out].set(w.T.astype(jnp.bfloat16))
    return wt, m_out, d_enc, m_pad


# ----------------------------------------------------------------------------
# Kernels
# ----------------------------------------------------------------------------
def _linear_kernel(enc_ref, wt_ref, out_ref):
    # (tm, D_enc) f32 activation, cast to bf16 in-register, MXU matmul, bf16 store.
    enc = enc_ref[...].astype(jnp.bfloat16)
    out_ref[...] = jnp.dot(enc, wt_ref[...],
                           preferred_element_type=jnp.float32).astype(out_ref.dtype)


def _fused_embed_linear_kernel(x_ref, s_ref, off_ref, wt_ref, out_ref, *, in_dim):
    # phase[:, j] = X[:, d(j)] * freq(j) (+ pi/2 for cosine columns);
    # enc = sin(phase) reproduces the [sin(x_d f_k)..., cos(x_d f_k)...] posenc layout.
    x = x_ref[...]                                    # (tm, in_dim)  f32
    s = s_ref[...]                                    # (in_dim, D_enc) f32 freq table
    phase = off_ref[...]                              # (1, D_enc) -> broadcasts
    for d in range(in_dim):                           # unrolled at trace time (tiny)
        phase = phase + x[:, d:d + 1] * s[d:d + 1, :]
    enc = jnp.sin(phase).astype(jnp.bfloat16)         # EUP sin; free under DMA-bound
    out_ref[...] = jnp.dot(enc, wt_ref[...],
                           preferred_element_type=jnp.float32).astype(out_ref.dtype)


# ----------------------------------------------------------------------------
# forward(): encoded_X @ W.T
# ----------------------------------------------------------------------------
def linear_mapping_forward_padded(encoded_x, linear_mappings, *, tm=1024):
    """forward() fast path: returns the lane-padded (N, 128k) bf16 slab.

    Columns >= M are exact zeros.  Prefer this variant when the consumer gathers
    columns (e.g. reflectance) so no (N,128)->(N,M) slice copy is made.
    """
    wt, _, d_enc, m_pad = _prepare_weight(linear_mappings)
    enc = jnp.asarray(encoded_x, jnp.float32)
    n = enc.shape[0]
    assert enc.shape[1] == d_enc
    n_pad, tm_eff = _pick_row_tiling(n, tm)
    if n_pad != n:
        enc = jnp.pad(enc, ((0, n_pad - n), (0, 0)))  # single pass; cast happens in-kernel

    out = pl.pallas_call(
        _linear_kernel,
        out_shape=jax.ShapeDtypeStruct((n_pad, m_pad), jnp.bfloat16),
        grid_spec=pltpu.PrefetchScalarGridSpec(
            num_scalar_prefetch=0,
            grid=(n_pad // tm_eff,),
            in_specs=[
                pl.BlockSpec((tm_eff, d_enc), lambda i: (i, 0)),  # activation row tile
                pl.BlockSpec((d_enc, m_pad), lambda i: (0, 0)),   # weight (VMEM-resident)
            ],
            out_specs=pl.BlockSpec((tm_eff, m_pad), lambda i: (i, 0)),
        ),
        compiler_params=pltpu.CompilerParams(
            dimension_semantics=("parallel",)),
    )(enc, wt)
    return out[:n] if n_pad != n else out


def linear_mapping_forward(encoded_x, linear_mappings, *, tm=1024):
    """Module forward(): (N, M) result (the narrow column copy is made only here)."""
    m_out = math.prod(linear_mappings.shape[:-1])
    return linear_mapping_forward_padded(encoded_x, linear_mappings, tm=tm)[:, :m_out]


# ----------------------------------------------------------------------------
# reflectance(): fused posenc + linear kernel, then a per-row column gather (XLA glue)
# ----------------------------------------------------------------------------
# TODO(synk): emb.get_posenc_embedder may also prepend the raw input channels; the kernel
# implements the standard sin/cos posenc layout that matches linear_mappings' last dim.
def _make_posenc_tables(in_dim, num_freqs):
    d_enc = in_dim * 2 * num_freqs
    freqs = 2.0 ** jnp.arange(num_freqs, dtype=jnp.float32)
    s = jnp.zeros((in_dim, d_enc), jnp.float32)
    off = jnp.zeros((1, d_enc), jnp.float32)
    for d in range(in_dim):
        base = d * 2 * num_freqs
        s = s.at[d, base:base + num_freqs].set(freqs)                     # sin columns
        s = s.at[d, base + num_freqs:base + 2 * num_freqs].set(freqs)     # cos columns
        off = off.at[0, base + num_freqs:base + 2 * num_freqs].set(math.pi / 2.0)
    return s, off


def reflectance(X, cluster_ids, linear_mappings, num_freqs, *, tm=1024):
    x = jnp.asarray(X, jnp.float32)
    n, in_dim = x.shape
    wt, _, d_enc, m_pad = _prepare_weight(linear_mappings)
    assert d_enc == in_dim * 2 * num_freqs
    s, off = _make_posenc_tables(in_dim, num_freqs)
    n_pad, tm_eff = _pick_row_tiling(n, tm)
    if n_pad != n:
        x = jnp.pad(x, ((0, n_pad - n), (0, 0)))      # 16 B/row; only pre-pass over X

    kernel = functools.partial(_fused_embed_linear_kernel, in_dim=in_dim)
    slab = pl.pallas_call(
        kernel,
        out_shape=jax.ShapeDtypeStruct((n_pad, m_pad), jnp.bfloat16),
        grid_spec=pltpu.PrefetchScalarGridSpec(
            num_scalar_prefetch=0,
            grid=(n_pad // tm_eff,),
            in_specs=[
                pl.BlockSpec((tm_eff, in_dim), lambda i: (i, 0)),  # raw query points
                pl.BlockSpec((in_dim, d_enc), lambda i: (0, 0)),   # freq table (resident)
                pl.BlockSpec((1, d_enc), lambda i: (0, 0)),        # sin/cos phase offsets
                pl.BlockSpec((d_enc, m_pad), lambda i: (0, 0)),    # weight (resident)
            ],
            out_specs=pl.BlockSpec((tm_eff, m_pad), lambda i: (i, 0)),
        ),
        compiler_params=pltpu.CompilerParams(
            dimension_semantics=("parallel",)),
    )(x, s, off, wt)

    # Per-row cluster gather straight off the lane-padded slab: columns are always
    # < M <= 128, so padded lanes are never read and no (N,128)->(N,M) copy is made.
    # TODO(synk): a fully fused in-kernel gather needs a lane-dense repacking of the
    # (N, 3) result to avoid masked stores; kept as XLA glue per review.
    cid = jnp.asarray(cluster_ids, jnp.int32)
    if n_pad != n:
        cid = jnp.pad(cid, (0, n_pad - n))
    cols = jnp.stack([3 * cid, 3 * cid + 1, 3 * cid + 2], axis=-1)         # (n_pad, 3)
    rgb = jnp.take_along_axis(slab, cols, axis=-1)                          # (n_pad, 3)
    return rgb[:n] if n_pad != n else rgb


# ----------------------------------------------------------------------------
# Pure-JAX f32 references for the correctness check
# ----------------------------------------------------------------------------
def make_embed_fn(num_freqs):
    freqs = 2.0 ** jnp.arange(num_freqs, dtype=jnp.float32)

    def embed_fn(x):
        xf = x[..., None] * freqs                                     # (N, in_dim, F)
        enc = jnp.concatenate([jnp.sin(xf), jnp.cos(xf)], axis=-1)    # (N, in_dim, 2F)
        return enc.reshape(x.shape[0], -1)

    return embed_fn


def reference_forward(encoded_x, linear_mappings):
    w = linear_mappings.reshape(-1, linear_mappings.shape[-1])
    return jnp.dot(encoded_x, w.T, precision=jax.lax.Precision.HIGHEST)


if __name__ == "__main__":
    key = jax.random.PRNGKey(0)

    # Small, module-consistent shapes (N deliberately NOT a multiple of the tile).
    N = 1000              # query points / rays
    in_dim = 4
    num_freqs = 4
    d_enc = in_dim * 2 * num_freqs     # 32
    n_clusters = 8                     # M = n_clusters * 3 = 24 output features

    k_x, k_lm, k_c = jax.random.split(key, 3)
    X = jax.random.normal(k_x, (N, in_dim), dtype=jnp.float32)
    linear_mappings = jax.random.normal(k_lm, (n_clusters, 3, d_enc), jnp.float32) * 0.1
    cluster_ids = jax.random.randint(k_c, (N,), 0, n_clusters)

    embed_fn = make_embed_fn(num_freqs)
    encoded_X = embed_fn(X)                                   # (N, 32) -- reference embed

    # forward(): single no-bias linear via the Pallas kernel.
    out = linear_mapping_forward(encoded_X, linear_mappings, tm=1024)
    out = jax.block_until_ready(out)

    ref = reference_forward(encoded_X, linear_mappings)
    assert out.shape == (N, n_clusters * 3)
    err = jnp.max(jnp.abs(out.astype(jnp.float32) - ref))
    assert err < 3e-2, f"forward mismatch vs reference: {err}"   # bf16 operand+output tol

    # reflectance(): fused posenc + linear kernel + gather glue.
    rgb = reflectance(X, cluster_ids, linear_mappings, num_freqs, tm=1024)
    rgb = jax.block_until_ready(rgb)
    cols = jnp.stack([3 * cluster_ids, 3 * cluster_ids + 1, 3 * cluster_ids + 2], axis=-1)
    rgb_ref = jnp.take_along_axis(ref, cols, axis=-1)
    assert rgb.shape == (N, 3)
    err_rgb = jnp.max(jnp.abs(rgb.astype(jnp.float32) - rgb_ref))
    assert err_rgb < 3e-2, f"reflectance mismatch vs reference: {err_rgb}"

    print("KERNEL_OK")
</pallas_src>

<mosaic_0001>
module attributes {stable_mosaic.version = 11 : i64} {
  func.func @_linear_kernel(%arg0: i32, %arg1: memref<512x32xf32, #tpu.memory_space<vmem>>, %arg2: memref<32x128xbf16, #tpu.memory_space<vmem>>, %arg3: memref<512x128xbf16, #tpu.memory_space<vmem>>) attributes {dimension_semantics = [#tpu.dimension_semantics<parallel>], iteration_bounds = array<i64: 2>, scalar_prefetch = 0 : i64, scratch_operands = 0 : i64, tpu.core_type = #tpu.core_type<tc>, window_params = [{transform_indices = @transform_0, window_bounds = array<i64: 512, 32>}, {pipeline_mode = #tpu.pipeline_mode<synchronous>, transform_indices = @transform_1, window_bounds = array<i64: 32, 128>}, {transform_indices = @transform_2, window_bounds = array<i64: 512, 128>}]} {
    %c0 = arith.constant 0 : index
    %c0_0 = arith.constant 0 : index
    %0 = vector.load %arg1[%c0, %c0_0] : memref<512x32xf32, #tpu.memory_space<vmem>>, vector<512x32xf32>
    %1 = arith.truncf %0 : vector<512x32xf32> to vector<512x32xbf16>
    %c0_1 = arith.constant 0 : index
    %c0_2 = arith.constant 0 : index
    %2 = vector.load %arg2[%c0_1, %c0_2] : memref<32x128xbf16, #tpu.memory_space<vmem>>, vector<32x128xbf16>
    %cst = arith.constant dense<0.000000e+00> : vector<512x128xf32>
    %3 = tpu.matmul %1, %2, %cst {dimension_numbers = #tpu.dot_dimension_numbers<[1], [0], [0], [1], [0, 0, 1, 1], [], []>} : vector<512x32xbf16>, vector<32x128xbf16>, vector<512x128xf32> -> vector<512x128xf32>
    %4 = arith.truncf %3 : vector<512x128xf32> to vector<512x128xbf16>
    %c0_3 = arith.constant 0 : index
    %c0_4 = arith.constant 0 : index
    %5 = vector.load %arg3[%c0_3, %c0_4] : memref<512x128xbf16, #tpu.memory_space<vmem>>, vector<512x128xbf16>
    tpu.vector_store %arg3[%c0_3, %c0_4], %4 {strides = array<i32>} : memref<512x128xbf16, #tpu.memory_space<vmem>>, vector<512x128xbf16>,
    return
  }
  func.func @transform_0(%arg0: i32) -> (i32, i32) {
    %c0_i32 = arith.constant 0 : i32
    %c0_i32_0 = arith.constant 0 : i32
    return %arg0, %c0_i32 : i32, i32
  }
  func.func @transform_1(%arg0: i32) -> (i32, i32) {
    %c0_i32 = arith.constant 0 : i32
    %c0_i32_0 = arith.constant 0 : i32
    %c0_i32_1 = arith.constant 0 : i32
    return %c0_i32, %c0_i32_0 : i32, i32
  }
  func.func @transform_2(%arg0: i32) -> (i32, i32) {
    %c0_i32 = arith.constant 0 : i32
    %c0_i32_0 = arith.constant 0 : i32
    return %arg0, %c0_i32 : i32, i32
  }
}

</mosaic_0001>

<bundles_post_ra>
// kernel: tpu_custom_call.1
= control target key start
LH: loop header
LB: loop body
LE: loop exit
PB: predicated region body
PF: predicated region fallthrough
CT: control target
= control target key end

     0   :  { %7 = vsyncpa [#allocation3], 0  ;;  %s1882_s0 = inlined_call_operand.vmem [shape: f32[1024,32], index: 0, kind: input, shape index: {}]   ;;  %s1883_s1 = inlined_call_operand.vmem [shape: bf16[32,128], index: 1, kind: input, shape index: {}]   ;;  %s1884_s2 = inlined_call_operand.hbm [shape: bf16[1024,128], index: 2, kind: output, shape index: {}]  }
   0x1   :  { %9 = vsyncpa [#allocation3 + $0x1], 0  ;;  %s1637_s9 = smov 0   ;;  %s1639_s10 = smov 0  }
   0x2   :  { %s1641_s11 = smov 0   ;;  %s1643_s12 = smov 0  }
   0x3 LB: > { %s1658_s13 = sadd.s32 4294967295, %s1617_s12   ;;  %s1040_s14 = sadd.s32 4294967294, %s1617_s12   ;;  %s1617_s12 = sphi %s1643_s12, %s1890_s12   ;;  %s1613_s11 = sphi %s1641_s11, %s1889_s11   ;;  %s1609_s10 = sphi %s1639_s10, %s1888_s10   ;;  %s1605_s9 = sphi %s1637_s9, %s1887_s9  }
   0x4   : > { %s1662_s15 = sadd.s32 1, %s1617_s12   ;;  %s69_s16 = sadd.s32 1, %s1613_s11 }
   0x5   : > { %s66_s17 = ssub.s32 %s1617_s12, %s1662_s15  ;;  %p79_p0 = scmp.ne.s32.totalorder %s1613_s11, %s1609_s10 }
   0x6   : > { %p67_p1 = scmp.eq.s32.totalorder %s66_s17, 0  ;;  %p80_p2 = scmp.eq.s32.totalorder %s1658_s13, 1 }
   0x7   : > { %p85_p3 = scmp.ne.s32.totalorder %s1609_s10, %s1605_s9  ;;  %p86_p4 = scmp.eq.s32.totalorder %s1040_s14, 1 }
   0x8   : > { %s1673_s18 = scalar_select %p67_p1, %s1613_s11, %s69_s16  }
   0x9   : > { %p1675_p5 = por %p80_p2, %p79_p0  ;;  %p1679_p6 = por %p86_p4, %p85_p3 }
   0xa   : > { %p1043_p7 = scmp.ge.s32.totalorder %s1617_s12, 1  ;;  %p116_p8 = scmp.lt.s32.totalorder %s1617_s12, 3 }
   0xc   : > { %p117_p9 = pnand %p1043_p7, %p116_p8 }
   0xd   : > { %v1553_v0 = vld [vmem:[%s1883_s1] sm:$0xff] (!%p117_p9)   ;;  %s1045_s23 = sshll.u32 (!%p117_p9), %s1658_s13, 6  ;;  %v1554_v1 = vld [vmem:[%s1883_s1 + $0x8] sm:$0xff] (!%p117_p9)   ;;  %vm258_vm0 = vcmask (!%p117_p9), 261120   ;;  %s135_s30 = sand.u32 (!%p117_p9), 1, %s1609_s10  }
   0xe   : > { %120 = sbr.rel (%p117_p9) target bundleno = 317 (0x13d), region = 28  ;;  %p139_p10 = scmp.lt.s32.totalorder (!%p117_p9), %s1045_s23, 127  ;;  %1440 = vmatprep.subr.bf16.mxu0 (!%p117_p9), %v1553_v0  ;;  %1508 = vmatprep.subr.bf16.mxu1 (!%p117_p9), %v1553_v0 }
   0xf   : > { %1441 = vmatpush3.bf16.msra.mxu0 (!%p117_p9), %v1553_v0  ;;  %1510 = vmatpush3.bf16.msra.mxu1 (!%p117_p9), %v1553_v0  ;;  %s1044_s3 = sshll.u32 (!%p117_p9), %s135_s30, 8  ;;  %s1214_s5 = sshll.u32 (!%p117_p9), %s1658_s13, 12 }
  0x10   : > { %1442 = vmatprep.subr.bf16.mxu0 (!%p117_p9), %v1554_v1  ;;  %1509 = vmatprep.subr.bf16.mxu1 (!%p117_p9), %v1554_v1  ;;  %s1796_s4 = scalar_lea.vmem (!%p117_p9), [#allocation2], %s1044_s3  ;;  %s1831_s14 = scalar_lea.hbm (!%p117_p9), %s1884_s2, %s1214_s5 }
  0x11   : > { %s978_s6 = sshll.u32 (!%p117_p9), %s1796_s4, 4  ;;  %s1841_s13 = scalar_lea.sflag (!%p117_p9), [#allocation3], %s135_s30  ;;  %s1833_s6 = int_to_ptr.vmem [resolvable:$true] %s978_s6 }
  0x12   : > { %s1555_s16 = scalar_lea.vmem (!%p117_p9), %s1833_s6, 4096  ;;  %s1619_s17 = smov (!%p117_p9), [#allocation2]  }
  0x13   : > { %1443 = vmatpush3.bf16.msra.mxu0 (!%p117_p9), %v1554_v1  ;;  %1511 = vmatpush3.bf16.msra.mxu1 (!%p117_p9), %v1554_v1  ;;  %p1556_p11 = scmp.ne.s32.totalorder (!%p117_p9), %s1833_s6, %s1555_s16  ;;  %s1559_s21 = sshll.u32 (!%p117_p9), %s1619_s17, 4  ;;  %s1560_s21 = int_to_ptr.vmem [resolvable:$false] %s1559_s21 }
  0x14   : > { %s1561_s22 = scalar_lea.vmem (!%p117_p9), %s1560_s21, 8192  ;;  %p1562_p0 = scmp.lt.s32.totalorder (!%p117_p9), %s1833_s6, %s1560_s21 }
  0x15   : > { %s1892_s23 = smov (!%p139_p10, %s1045_s23), 127  ;;  %p1557_p12 = pnand %p1556_p11, %p1675_p5 }
  0x16   : > { %s1046_s26 = sshll.u32 %s1892_s23, 3  ;;  %p1563_p1 = scmp.lt.s32.totalorder %s1561_s22, %s1555_s16 }
  0x17   : > { %s1695_s29 = scalar_lea.vmem %s1882_s0, %s1046_s26  ;;  %p1558_p13 = pneg %p1557_p12 }
  0x18   : > { %v146_v2 = vld [vmem:[%s1695_s29] sm:$0xff]  ;;  %v147_v3 = vld [vmem:[%s1695_s29 + $0x8] sm:$0xff]  ;;  %v148_v7 = vld [vmem:[%s1695_s29 + $0x10] sm:$0xff]  ;;  %p1564_p2 = por %p1563_p1, %p1562_p0 }
  0x19   : > { %v178_v4 = vld [vmem:[%s1695_s29 + $0x100] sm:$0xff]  ;;  %v210_v5 = vpack.c.bf16 %v147_v3, %v146_v2  ;;  %v179_v6 = vld [vmem:[%s1695_s29 + $0x108] sm:$0xff]  ;;  %v149_v8 = vld [vmem:[%s1695_s29 + $0x18] sm:$0xff] }
  0x1a   : > { %v226_v9 = vpack.c.bf16 %v179_v6, %v178_v4  ;;  %v211_v10 = vpack.c.bf16 %v149_v8, %v148_v7  ;;  %v180_v11 = vld [vmem:[%s1695_s29 + $0x110] sm:$0xff]  ;;  %v181_v12 = vld [vmem:[%s1695_s29 + $0x118] sm:$0xff]  ;;  %v150_v13 = vld [vmem:[%s1695_s29 + $0x20] sm:$0xff]  ;;  %p1565_p3 = pnand %p1564_p2, %p1558_p13 }
  0x1b   : > { %1444 = vmatprep.mubr.msk.bf16.mxu0 %vm258_vm0, %v210_v5  ;;  %v227_v14 = vpack.c.bf16 %v181_v12, %v180_v11  ;;  %v151_v15 = vld [vmem:[%s1695_s29 + $0x28] sm:$0xff]  ;;  %v182_v16 = vld [vmem:[%s1695_s29 + $0x120] sm:$0xff]  ;;  %v152_v20 = vld [vmem:[%s1695_s29 + $0x30] sm:$0xff] }
  0x1c   : > { %v183_v17 = vld [vmem:[%s1695_s29 + $0x128] sm:$0xff]  ;;  %1476 = vmatprep.mubr.msk.bf16.mxu1 %vm258_vm0, %v226_v9  ;;  %1445 = vmatmul.mubr.msk.bf16.vlgmr.msra.gmra.mrb[0].mxu0 %vm258_vm0, %v211_v10  ;;  %v212_v18 = vpack.c.bf16 %v151_v15, %v150_v13  ;;  %v153_v21 = vld [vmem:[%s1695_s29 + $0x38] sm:$0xff]  ;;  %v184_v22 = vld [vmem:[%s1695_s29 + $0x130] sm:$0xff] }
  0x1d   : > { %v228_v19 = vpack.c.bf16 %v183_v17, %v182_v16  ;;  %1477 = vmatmul.mubr.msk.bf16.vlgmr.msra.gmra.mrb[0].mxu1 %vm258_vm0, %v227_v14  ;;  %v185_v23 = vld [vmem:[%s1695_s29 + $0x138] sm:$0xff]  ;;  %v154_v24 = vld [vmem:[%s1695_s29 + $0x40] sm:$0xff]  ;;  %v155_v25 = vld [vmem:[%s1695_s29 + $0x48] sm:$0xff]  ;;  %v213_v28 = vpack.c.bf16 %v153_v21, %v152_v20 }
  0x1e   : > { %1448 = vmatprep.mubr.msk.bf16.mxu0 %vm258_vm0, %v212_v18  ;;  %v186_v26 = vld [vmem:[%s1695_s29 + $0x140] sm:$0xff]  ;;  %v187_v27 = vld [vmem:[%s1695_s29 + $0x148] sm:$0xff]  ;;  %v229_v29 = vpack.c.bf16 %v185_v23, %v184_v22  ;;  %v214_v30 = vpack.c.bf16 %v155_v25, %v154_v24  ;;  %v156_v32 = vld [vmem:[%s1695_s29 + $0x50] sm:$0xff] }
  0x1f   : > { %1480 = vmatprep.mubr.msk.bf16.mxu1 %vm258_vm0, %v228_v19  ;;  %v230_v31 = vpack.c.bf16 %v187_v27, %v186_v26  ;;  %v157_v33 = vld [vmem:[%s1695_s29 + $0x58] sm:$0xff]  ;;  %v188_v34 = vld [vmem:[%s1695_s29 + $0x150] sm:$0xff]  ;;  %v158_v36 = vld [vmem:[%s1695_s29 + $0x60] sm:$0xff] }
  0x20   : > { %v189_v35 = vld [vmem:[%s1695_s29 + $0x158] sm:$0xff]  ;;  %v159_v37 = vld [vmem:[%s1695_s29 + $0x68] sm:$0xff]  ;;  %v190_v38 = vld [vmem:[%s1695_s29 + $0x160] sm:$0xff]  ;;  %v215_v40 = vpack.c.bf16 %v157_v33, %v156_v32 }
  0x21   : > { %v191_v39 = vld [vmem:[%s1695_s29 + $0x168] sm:$0xff]  ;;  %v231_v41 = vpack.c.bf16 %v189_v35, %v188_v34  ;;  %v216_v42 = vpack.c.bf16 %v159_v37, %v158_v36  ;;  %v160_v44 = vld [vmem:[%s1695_s29 + $0x70] sm:$0xff]  ;;  %v161_v45 = vld [vmem:[%s1695_s29 + $0x78] sm:$0xff] }
  0x22   : > { %v232_v43 = vpack.c.bf16 %v191_v39, %v190_v38  ;;  %v192_v46 = vld [vmem:[%s1695_s29 + $0x170] sm:$0xff]  ;;  %v193_v47 = vld [vmem:[%s1695_s29 + $0x178] sm:$0xff]  ;;  %v162_v48 = vld [vmem:[%s1695_s29 + $0x80] sm:$0xff]  ;;  %v217_v52 = vpack.c.bf16 %v161_v45, %v160_v44 }
  0x23   : > { %v163_v49 = vld [vmem:[%s1695_s29 + $0x88] sm:$0xff]  ;;  %v194_v50 = vld [vmem:[%s1695_s29 + $0x180] sm:$0xff]  ;;  %v233_v53 = vpack.c.bf16 %v193_v47, %v192_v46  ;;  %v164_v56 = vld [vmem:[%s1695_s29 + $0x90] sm:$0xff] }
  0x24   : > { %1449 = vmatmul.mubr.msk.bf16.gmra.mrb[4].mxu0 %vm258_vm0, %v213_v28  ;;  %v195_v51 = vld [vmem:[%s1695_s29 + $0x188] sm:$0xff]  ;;  %v218_v54 = vpack.c.bf16 %v163_v49, %v162_v48  ;;  %v165_v57 = vld [vmem:[%s1695_s29 + $0x98] sm:$0xff]  ;;  %v196_v58 = vld [vmem:[%s1695_s29 + $0x190] sm:$0xff] }
  0x25   : > { %1481 = vmatmul.mubr.msk.bf16.gmra.mrb[4].mxu1 %vm258_vm0, %v229_v29  ;;  %1452 = vmatprep.mubr.msk.bf16.mxu0 %vm258_vm0, %v214_v30  ;;  %v234_v55 = vpack.c.bf16 %v195_v51, %v194_v50  ;;  %v197_v59 = vld [vmem:[%s1695_s29 + $0x198] sm:$0xff]  ;;  %v166_v60 = vld [vmem:[%s1695_s29 + $0xa0] sm:$0xff]  ;;  %v167_v61 = vld [vmem:[%s1695_s29 + $0xa8] sm:$0xff]  ;;  %v219_v0 = vpack.c.bf16 %v165_v57, %v164_v56 }
  0x26   : > { %1484 = vmatprep.mubr.msk.bf16.mxu1 %vm258_vm0, %v230_v31  ;;  %v198_v62 = vld [vmem:[%s1695_s29 + $0x1a0] sm:$0xff]  ;;  %v199_v63 = vld [vmem:[%s1695_s29 + $0x1a8] sm:$0xff]  ;;  %v235_v1 = vpack.c.bf16 %v197_v59, %v196_v58  ;;  %v220_v2 = vpack.c.bf16 %v167_v61, %v166_v60  ;;  %v168_v4 = vld [vmem:[%s1695_s29 + $0xb0] sm:$0xff] }
  0x27   : > { %v236_v3 = vpack.c.bf16 %v199_v63, %v198_v62  ;;  %v169_v5 = vld [vmem:[%s1695_s29 + $0xb8] sm:$0xff]  ;;  %v200_v6 = vld [vmem:[%s1695_s29 + $0x1b0] sm:$0xff]  ;;  %v170_v8 = vld [vmem:[%s1695_s29 + $0xc0] sm:$0xff] }
  0x28   : > { %v201_v7 = vld [vmem:[%s1695_s29 + $0x1b8] sm:$0xff]  ;;  %v171_v9 = vld [vmem:[%s1695_s29 + $0xc8] sm:$0xff]  ;;  %v202_v10 = vld [vmem:[%s1695_s29 + $0x1c0] sm:$0xff]  ;;  %v221_v12 = vpack.c.bf16 %v169_v5, %v168_v4 }
  0x29   : > { %v203_v11 = vld [vmem:[%s1695_s29 + $0x1c8] sm:$0xff]  ;;  %v237_v13 = vpack.c.bf16 %v201_v7, %v200_v6  ;;  %v222_v14 = vpack.c.bf16 %v171_v9, %v170_v8  ;;  %v172_v16 = vld [vmem:[%s1695_s29 + $0xd0] sm:$0xff]  ;;  %v173_v17 = vld [vmem:[%s1695_s29 + $0xd8] sm:$0xff] }
  0x2a   : > { %v238_v15 = vpack.c.bf16 %v203_v11, %v202_v10  ;;  %v204_v18 = vld [vmem:[%s1695_s29 + $0x1d0] sm:$0xff]  ;;  %v205_v19 = vld [vmem:[%s1695_s29 + $0x1d8] sm:$0xff]  ;;  %v174_v20 = vld [vmem:[%s1695_s29 + $0xe0] sm:$0xff]  ;;  %v223_v24 = vpack.c.bf16 %v173_v17, %v172_v16 }
  0x2b   : > { %v175_v21 = vld [vmem:[%s1695_s29 + $0xe8] sm:$0xff]  ;;  %v206_v22 = vld [vmem:[%s1695_s29 + $0x1e0] sm:$0xff]  ;;  %v239_v25 = vpack.c.bf16 %v205_v19, %v204_v18  ;;  %v176_v28 = vld [vmem:[%s1695_s29 + $0xf0] sm:$0xff] }
  0x2c   : > { %1453 = vmatmul.mubr.msk.bf16.gmra.mrb[8].mxu0 %vm258_vm0, %v215_v40  ;;  %v207_v23 = vld [vmem:[%s1695_s29 + $0x1e8] sm:$0xff]  ;;  %v224_v26 = vpack.c.bf16 %v175_v21, %v174_v20  ;;  %v177_v29 = vld [vmem:[%s1695_s29 + $0xf8] sm:$0xff]  ;;  %v208_v30 = vld [vmem:[%s1695_s29 + $0x1f0] sm:$0xff] }
  0x2d   : > { %1485 = vmatmul.mubr.msk.bf16.gmra.mrb[8].mxu1 %vm258_vm0, %v231_v41  ;;  %1456 = vmatprep.mubr.msk.bf16.mxu0 %vm258_vm0, %v216_v42  ;;  %v240_v27 = vpack.c.bf16 %v207_v23, %v206_v22  ;;  %v209_v31 = vld [vmem:[%s1695_s29 + $0x1f8] sm:$0xff]  ;;  %v225_v32 = vpack.c.bf16 %v177_v29, %v176_v28 }
  0x2e   : > { %1488 = vmatprep.mubr.msk.bf16.mxu1 %vm258_vm0, %v232_v43  ;;  %v241_v33 = vpack.c.bf16 %v209_v31, %v208_v30 }
  0x34   : > { %1457 = vmatmul.mubr.msk.bf16.gmra.mrb[12].mxu0 %vm258_vm0, %v217_v52 }
  0x35   : > { %1489 = vmatmul.mubr.msk.bf16.gmra.mrb[12].mxu1 %vm258_vm0, %v233_v53  ;;  %1460 = vmatprep.mubr.msk.bf16.mxu0 %vm258_vm0, %v218_v54 }
  0x36   : > { %1492 = vmatprep.mubr.msk.bf16.mxu1 %vm258_vm0, %v234_v55 }
  0x3c   : > { %1461 = vmatmul.mubr.msk.bf16.gmra.mrb[16].mxu0 %vm258_vm0, %v219_v0 }
  0x3d   : > { %1493 = vmatmul.mubr.msk.bf16.gmra.mrb[16].mxu1 %vm258_vm0, %v235_v1  ;;  %1464 = vmatprep.mubr.msk.bf16.mxu0 %vm258_vm0, %v220_v2 }
  0x3e   : > { %1496 = vmatprep.mubr.msk.bf16.mxu1 %vm258_vm0, %v236_v3 }
  0x44   : > { %1465 = vmatmul.mubr.msk.bf16.gmra.mrb[20].mxu0 %vm258_vm0, %v221_v12 }
  0x45   : > { %1497 = vmatmul.mubr.msk.bf16.gmra.mrb[20].mxu1 %vm258_vm0, %v237_v13  ;;  %1468 = vmatprep.mubr.msk.bf16.mxu0 %vm258_vm0, %v222_v14 }
  0x46   : > { %1500 = vmatprep.mubr.msk.bf16.mxu1 %vm258_vm0, %v238_v15 }
  0x4c   : > { %1469 = vmatmul.mubr.msk.bf16.gmra.mrb[24].mxu0 %vm258_vm0, %v223_v24 }
  0x4d   : > { %1501 = vmatmul.mubr.msk.bf16.gmra.mrb[24].mxu1 %vm258_vm0, %v239_v25  ;;  %1472 = vmatprep.mubr.msk.bf16.mxu0 %vm258_vm0, %v224_v26 }
  0x4e   : > { %1504 = vmatprep.mubr.msk.bf16.mxu1 %vm258_vm0, %v240_v27 }
  0x54   : > { %1473 = vmatmul.mubr.msk.bf16.gmra.mrb[28].mxu0 %vm258_vm0, %v225_v32 }
  0x55   : > { %1505 = vmatmul.mubr.msk.bf16.gmra.mrb[28].mxu1 %vm258_vm0, %v241_v33 }
  0xef   : > { %v1446_v34 = vpop.f32.mrb[0].mxu0 }
  0xf0   : > { %v1478_v35 = vpop.f32.mrb[0].mxu1  ;;  %v389_v36 = vpop.f32.mrb[1].mxu0 }
  0xf1   : > { %v517_v37 = vpop.f32.mrb[1].mxu1  ;;  %v1447_v38 = vpop.f32.mrb[2].mxu0 }
  0xf2   : > { %v1223_v39 = vpack.c.bf16 %v1447_v38, %v1446_v34  ;;  %v1479_v40 = vpop.f32.mrb[2].mxu1  ;;  %v392_v41 = vpop.f32.mrb[3].mxu0 }
  0xf3   : > { %v1303_v42 = vpack.c.bf16 %v1479_v40, %v1478_v35  ;;  %v1218_v43 = vpack.c.bf16 %v392_v41, %v389_v36  ;;  %v520_v44 = vpop.f32.mrb[3].mxu1 }
  0xf4   : > { %1375 = vst [vmem:[%s1796_s4 + $0x8] sm:$0xff] %v1223_v39   ;;  %v1298_v45 = vpack.c.bf16 %v520_v44, %v517_v37 }
  0xf5   : > { %1391 = vst [vmem:[%s1796_s4 + $0x88] sm:$0xff] %v1303_v42   ;;  %1219 = vst [vmem:[%s1796_s4] sm:$0xff] %v1218_v43  }
  0xf6   : > { %1390 = vst [vmem:[%s1796_s4 + $0x80] sm:$0xff] %v1298_v45  }
  0xf7   : > { %v1450_v46 = vpop.f32.mrb[4].mxu0 }
  0xf8   : > { %v1482_v47 = vpop.f32.mrb[4].mxu1  ;;  %v405_v48 = vpop.f32.mrb[5].mxu0 }
  0xf9   : > { %v533_v49 = vpop.f32.mrb[5].mxu1  ;;  %v1451_v50 = vpop.f32.mrb[6].mxu0 }
  0xfa   : > { %v1233_v51 = vpack.c.bf16 %v1451_v50, %v1450_v46  ;;  %v1483_v52 = vpop.f32.mrb[6].mxu1  ;;  %v408_v53 = vpop.f32.mrb[7].mxu0 }
  0xfb   : > { %v1313_v54 = vpack.c.bf16 %v1483_v52, %v1482_v47  ;;  %v1228_v55 = vpack.c.bf16 %v408_v53, %v405_v48  ;;  %v536_v56 = vpop.f32.mrb[7].mxu1 }
  0xfc   : > { %1377 = vst [vmem:[%s1796_s4 + $0x18] sm:$0xff] %v1233_v51   ;;  %v1308_v57 = vpack.c.bf16 %v536_v56, %v533_v49 }
  0xfd   : > { %1393 = vst [vmem:[%s1796_s4 + $0x98] sm:$0xff] %v1313_v54   ;;  %1376 = vst [vmem:[%s1796_s4 + $0x10] sm:$0xff] %v1228_v55  }
  0xfe   : > { %1392 = vst [vmem:[%s1796_s4 + $0x90] sm:$0xff] %v1308_v57  }
  0xff   : > { %v1454_v58 = vpop.f32.mrb[8].mxu0 }
 0x100   : > { %v1486_v59 = vpop.f32.mrb[8].mxu1  ;;  %v421_v60 = vpop.f32.mrb[9].mxu0 }
 0x101   : > { %v549_v61 = vpop.f32.mrb[9].mxu1  ;;  %v1455_v62 = vpop.f32.mrb[10].mxu0 }
 0x102   : > { %v1243_v63 = vpack.c.bf16 %v1455_v62, %v1454_v58  ;;  %v1487_v0 = vpop.f32.mrb[10].mxu1  ;;  %v424_v1 = vpop.f32.mrb[11].mxu0 }
 0x103   : > { %v1323_v2 = vpack.c.bf16 %v1487_v0, %v1486_v59  ;;  %v1238_v3 = vpack.c.bf16 %v424_v1, %v421_v60  ;;  %v552_v4 = vpop.f32.mrb[11].mxu1 }
 0x104   : > { %1379 = vst [vmem:[%s1796_s4 + $0x28] sm:$0xff] %v1243_v63   ;;  %v1318_v5 = vpack.c.bf16 %v552_v4, %v549_v61 }
 0x105   : > { %1395 = vst [vmem:[%s1796_s4 + $0xa8] sm:$0xff] %v1323_v2   ;;  %1378 = vst [vmem:[%s1796_s4 + $0x20] sm:$0xff] %v1238_v3  }
 0x106   : > { %1394 = vst [vmem:[%s1796_s4 + $0xa0] sm:$0xff] %v1318_v5  }
 0x107   : > { %v1458_v6 = vpop.f32.mrb[12].mxu0 }
 0x108   : > { %v1490_v7 = vpop.f32.mrb[12].mxu1  ;;  %v437_v8 = vpop.f32.mrb[13].mxu0 }
 0x109   : > { %v565_v9 = vpop.f32.mrb[13].mxu1  ;;  %v1459_v10 = vpop.f32.mrb[14].mxu0 }
 0x10a   : > { %v1253_v11 = vpack.c.bf16 %v1459_v10, %v1458_v6  ;;  %v1491_v12 = vpop.f32.mrb[14].mxu1  ;;  %v440_v13 = vpop.f32.mrb[15].mxu0 }
 0x10b   : > { %v1333_v14 = vpack.c.bf16 %v1491_v12, %v1490_v7  ;;  %v1248_v15 = vpack.c.bf16 %v440_v13, %v437_v8  ;;  %v568_v16 = vpop.f32.mrb[15].mxu1 }
 0x10c   : > { %1381 = vst [vmem:[%s1796_s4 + $0x38] sm:$0xff] %v1253_v11   ;;  %v1328_v17 = vpack.c.bf16 %v568_v16, %v565_v9 }
 0x10d   : > { %1397 = vst [vmem:[%s1796_s4 + $0xb8] sm:$0xff] %v1333_v14   ;;  %1380 = vst [vmem:[%s1796_s4 + $0x30] sm:$0xff] %v1248_v15  }
 0x10e   : > { %1396 = vst [vmem:[%s1796_s4 + $0xb0] sm:$0xff] %v1328_v17  }
 0x10f   : > { %v1462_v18 = vpop.f32.mrb[16].mxu0 }
 0x110   : > { %v1494_v19 = vpop.f32.mrb[16].mxu1  ;;  %v453_v20 = vpop.f32.mrb[17].mxu0 }
 0x111   : > { %v581_v21 = vpop.f32.mrb[17].mxu1  ;;  %v1463_v22 = vpop.f32.mrb[18].mxu0 }
 0x112   : > { %v1263_v23 = vpack.c.bf16 %v1463_v22, %v1462_v18  ;;  %v1495_v24 = vpop.f32.mrb[18].mxu1  ;;  %v456_v25 = vpop.f32.mrb[19].mxu0 }
 0x113   : > { %v1343_v26 = vpack.c.bf16 %v1495_v24, %v1494_v19  ;;  %v1258_v27 = vpack.c.bf16 %v456_v25, %v453_v20  ;;  %v584_v28 = vpop.f32.mrb[19].mxu1 }
 0x114   : > { %1383 = vst [vmem:[%s1796_s4 + $0x48] sm:$0xff] %v1263_v23   ;;  %v1338_v29 = vpack.c.bf16 %v584_v28, %v581_v21 }
 0x115   : > { %1399 = vst [vmem:[%s1796_s4 + $0xc8] sm:$0xff] %v1343_v26   ;;  %1382 = vst [vmem:[%s1796_s4 + $0x40] sm:$0xff] %v1258_v27  }
 0x116   : > { %1398 = vst [vmem:[%s1796_s4 + $0xc0] sm:$0xff] %v1338_v29  }
 0x117   : > { %v1466_v30 = vpop.f32.mrb[20].mxu0 }
 0x118   : > { %v1498_v31 = vpop.f32.mrb[20].mxu1  ;;  %v469_v32 = vpop.f32.mrb[21].mxu0 }
 0x119   : > { %v597_v33 = vpop.f32.mrb[21].mxu1  ;;  %v1467_v34 = vpop.f32.mrb[22].mxu0 }
 0x11a   : > { %v1273_v35 = vpack.c.bf16 %v1467_v34, %v1466_v30  ;;  %v1499_v36 = vpop.f32.mrb[22].mxu1  ;;  %v472_v37 = vpop.f32.mrb[23].mxu0 }
 0x11b   : > { %v1353_v38 = vpack.c.bf16 %v1499_v36, %v1498_v31  ;;  %v1268_v39 = vpack.c.bf16 %v472_v37, %v469_v32  ;;  %v600_v40 = vpop.f32.mrb[23].mxu1 }
 0x11c   : > { %1385 = vst [vmem:[%s1796_s4 + $0x58] sm:$0xff] %v1273_v35   ;;  %v1348_v41 = vpack.c.bf16 %v600_v40, %v597_v33 }
 0x11d   : > { %1401 = vst [vmem:[%s1796_s4 + $0xd8] sm:$0xff] %v1353_v38   ;;  %1384 = vst [vmem:[%s1796_s4 + $0x50] sm:$0xff] %v1268_v39  }
 0x11e   : > { %1400 = vst [vmem:[%s1796_s4 + $0xd0] sm:$0xff] %v1348_v41  }
 0x11f   : > { %v1470_v42 = vpop.f32.mrb[24].mxu0 }
 0x120   : > { %v1502_v43 = vpop.f32.mrb[24].mxu1  ;;  %v485_v44 = vpop.f32.mrb[25].mxu0 }
 0x121   : > { %v613_v45 = vpop.f32.mrb[25].mxu1  ;;  %v1471_v46 = vpop.f32.mrb[26].mxu0 }
 0x122   : > { %v1283_v47 = vpack.c.bf16 %v1471_v46, %v1470_v42  ;;  %v1503_v48 = vpop.f32.mrb[26].mxu1  ;;  %v488_v49 = vpop.f32.mrb[27].mxu0 }
 0x123   : > { %v1363_v50 = vpack.c.bf16 %v1503_v48, %v1502_v43  ;;  %v1278_v51 = vpack.c.bf16 %v488_v49, %v485_v44  ;;  %v616_v52 = vpop.f32.mrb[27].mxu1 }
 0x124   : > { %1387 = vst [vmem:[%s1796_s4 + $0x68] sm:$0xff] %v1283_v47   ;;  %v1358_v53 = vpack.c.bf16 %v616_v52, %v613_v45 }
 0x125   : > { %1403 = vst [vmem:[%s1796_s4 + $0xe8] sm:$0xff] %v1363_v50   ;;  %1386 = vst [vmem:[%s1796_s4 + $0x60] sm:$0xff] %v1278_v51  }
 0x126   : > { %1402 = vst [vmem:[%s1796_s4 + $0xe0] sm:$0xff] %v1358_v53  }
 0x127   : > { %v1474_v54 = vpop.f32.mrb[28].mxu0 }
 0x128   : > { %v1506_v55 = vpop.f32.mrb[28].mxu1  ;;  %v501_v56 = vpop.f32.mrb[29].mxu0 }
 0x129   : > { %v629_v57 = vpop.f32.mrb[29].mxu1  ;;  %v1475_v58 = vpop.f32.mrb[30].mxu0 }
 0x12a   : > { %v1293_v59 = vpack.c.bf16 %v1475_v58, %v1474_v54  ;;  %v1507_v60 = vpop.f32.mrb[30].mxu1  ;;  %v504_v61 = vpop.f32.mrb[31].mxu0 }
 0x12b   : > { %v1373_v62 = vpack.c.bf16 %v1507_v60, %v1506_v55  ;;  %v1288_v63 = vpack.c.bf16 %v504_v61, %v501_v56  ;;  %v632_v0 = vpop.f32.mrb[31].mxu1 }
 0x12c   : > { %1389 = vst [vmem:[%s1796_s4 + $0x78] sm:$0xff] %v1293_v59   ;;  %v1368_v1 = vpack.c.bf16 %v632_v0, %v629_v57 }
 0x12d   : > { %1405 = vst [vmem:[%s1796_s4 + $0xf8] sm:$0xff] %v1373_v62   ;;  %1388 = vst [vmem:[%s1796_s4 + $0x70] sm:$0xff] %v1288_v63  }
 0x12e   : > { %1404 = vst [vmem:[%s1796_s4 + $0xf0] sm:$0xff] %v1368_v1  }
 0x12f   : > { %1568 = shalt.err (!%p1565_p3)
}
 0x130   : > { %s1569_s23 = scalar_lea.hbm %s1831_s14, 4096  ;;  %s1573_s26 = scalar_lea.hbm %s1884_s2, 8192 }
 0x131   : > { %p1570_p4 = scmp.ne.s32.totalorder %s1831_s14, %s1569_s23  ;;  %p1574_p9 = scmp.lt.u32.totalorder %s1831_s14, %s1884_s2 }
 0x132   : > { %p1575_p10 = scmp.lt.u32.totalorder %s1573_s26, %s1569_s23  ;;  %p1577_p12 = scmp.lt.u32.totalorder %s1569_s23, %s1831_s14 }
 0x133   : > { %p1571_p7 = pnand %p1570_p4, %p1675_p5 }
 0x134   : > { %p1576_p11 = por %p1575_p10, %p1574_p9 }
 0x135   : > { %p1572_p8 = pneg %p1571_p7 }
 0x136   : > { %p1578_p13 = por %p1577_p12, %p1576_p11 }
 0x138   : > { %p1579_p0 = pnand %p1578_p13, %p1572_p8 }
 0x13a   : > { %1582 = shalt.err (!%p1579_p0)
}
 0x13b   : > { %s1620_s29 = smov 64   ;;  %s1621_s30 = smov 4  }
 0x13c   : > { %1512 = dma.vmem_to_hbm [thread:$0]  (%p1675_p5), %s1833_s6, 4096, %s1831_s14, %s1841_s13, %s1620_s29, %s1620_s29, %s1621_s30  }
 0x13d PF: > { %p1518_p1 = scmp.ge.s32.totalorder %s1617_s12, 2  ;;  %s993_s3 = sand.u32 1, %s1605_s9  }
 0x13e   : > { %s994_s4 = scalar_lea.sflag [#allocation3], %s993_s3 }
 0x13f   : > { %p1515_p2 = pnand %p1518_p1, %p1679_p6 }
 0x141   : > { %1600 = dma.done.wait (!%p1515_p2), %s994_s4, 4096  }
 0x142   : > { %1602 = vsyncadd (!%p1515_p2), %s994_s4, 4294963200  ;;  %p12_p3 = scmp.ge.s32.totalorder %s1662_s15, 4   ;;  %s1887_s9 = smov %s1609_s10 }
 0x143   : > { %s1888_s10 = smov %s1613_s11  ;;  %s1889_s11 = smov %s1673_s18 }
 0x144   : > { %s1890_s12 = smov %s1662_s15  ;;  %14 = sbr.rel (!%p12_p3) target bundleno = 3 (0x3), region = 63 }
 0x14b   :  { %999 = vsyncpa [#allocation3], 1 }
 0x14c   :  { %1001 = vsyncpa [#allocation3 + $0x1], 1 }

</bundles_post_ra>
